<compile_context>
chip_gen: v5e
topology: v5e:2x2
jax: 0.10.0
libtpu: 0.0.40
codegen_flags: <defaults>
</compile_context>

<pallas_src>
import functools

import jax
import jax.numpy as jnp
import numpy as np
from jax.experimental import pallas as pl
from jax.experimental.pallas import tpu as pltpu


def _round_up(v, m):
    return (v + m - 1) // m * m


# ----------------------------------------------------------------------------
# Kernel 1: all three 'cna' branches as one fused matmul + affine + ReLU.
# Fused weight rows: [0:Cr_p) = top (padded), [Cr_p:2Cr_p) = mid (pre-scaled
# by 1/N, padded), [2Cr_p:2Cr_p+C_p) = bot (padded).  Splits are 8-aligned.
# ----------------------------------------------------------------------------
def _branch_kernel(x_ref, w_ref, b_ref, top_ref, phi_ref, bot_ref, *,
                   cr, c, cr_p):
    x = x_ref[0]                                            # (C, tn), lanes=tn
    z = jnp.dot(w_ref[...], x, preferred_element_type=jnp.float32)
    z = jnp.maximum(z + b_ref[...], 0.0)                    # fused bias/BN+ReLU
    top_ref[0] = z[0:cr].astype(top_ref.dtype)
    phi_ref[0] = z[cr_p:cr_p + cr].astype(phi_ref.dtype)
    bot_ref[0] = z[2 * cr_p:2 * cr_p + c].astype(bot_ref.dtype)


def _run_branches(x_cn, w_all, b_all, cr, cr_p, tn, out_dtype):
    B, C, N = x_cn.shape
    Rp = w_all.shape[0]
    nt = N // tn
    kernel = functools.partial(_branch_kernel, cr=cr, c=C, cr_p=cr_p)
    grid_spec = pltpu.PrefetchScalarGridSpec(
        num_scalar_prefetch=0,
        grid=(B, nt),
        in_specs=[
            pl.BlockSpec((1, C, tn), lambda b, n: (b, 0, n)),   # x tile
            pl.BlockSpec((Rp, C), lambda b, n: (0, 0)),         # fused weight
            pl.BlockSpec((Rp, 1), lambda b, n: (0, 0)),         # fused bias
        ],
        out_specs=[
            pl.BlockSpec((1, cr, tn), lambda b, n: (b, 0, n)),  # top
            pl.BlockSpec((1, cr, tn), lambda b, n: (b, 0, n)),  # phi (mid/N)
            pl.BlockSpec((1, C, tn), lambda b, n: (b, 0, n)),   # bot
        ],
    )
    return pl.pallas_call(
        kernel,
        out_shape=(
            jax.ShapeDtypeStruct((B, cr, N), out_dtype),
            jax.ShapeDtypeStruct((B, cr, N), out_dtype),
            jax.ShapeDtypeStruct((B, C, N), out_dtype),
        ),
        grid_spec=grid_spec,
        compiler_params=pltpu.CompilerParams(
            dimension_semantics=("parallel", "parallel")),
    )(x_cn, w_all, b_all)


# ----------------------------------------------------------------------------
# Kernel 2: attention = phi @ theta, accumulated over N tiles (phi already
# carries 1/N).  Output block is resident across the reduction axis.
# ----------------------------------------------------------------------------
def _attn_kernel(phi_ref, theta_ref, attn_ref):
    @pl.when(pl.program_id(1) == 0)
    def _():
        attn_ref[...] = jnp.zeros_like(attn_ref)
    attn_ref[0] += jnp.dot(phi_ref[0], theta_ref[0],
                           preferred_element_type=jnp.float32)


def _run_attn(phi, theta, tn):
    B, Cr, N = phi.shape
    C = theta.shape[2]
    nt = N // tn
    grid_spec = pltpu.PrefetchScalarGridSpec(
        num_scalar_prefetch=0,
        grid=(B, nt),                                   # reduction axis last
        in_specs=[
            pl.BlockSpec((1, Cr, tn), lambda b, n: (b, 0, n)),
            pl.BlockSpec((1, tn, C), lambda b, n: (b, n, 0)),
        ],
        out_specs=pl.BlockSpec((1, Cr, C), lambda b, n: (b, 0, 0)),
    )
    return pl.pallas_call(
        _attn_kernel,
        out_shape=jax.ShapeDtypeStruct((B, Cr, C), jnp.float32),
        grid_spec=grid_spec,
        compiler_params=pltpu.CompilerParams(
            dimension_semantics=("parallel", "arbitrary")),
    )(phi, theta)


# ----------------------------------------------------------------------------
# Kernel 3: out = out0 @ attention (single MXU dot) ; y = gamma * out + x.
# attention is held resident; out0 / x / y stream over N tiles.
# ----------------------------------------------------------------------------
def _out_kernel(gamma_ref, attn_ref, out0_ref, x_ref, y_ref):
    attn = attn_ref[0]                                      # (Cr, C), f32
    out0 = out0_ref[0].astype(jnp.float32)                  # (tn, Cr)
    out = jnp.dot(out0, attn, preferred_element_type=jnp.float32)   # (tn, C)
    y = gamma_ref[0] * out + x_ref[0].astype(jnp.float32)
    y_ref[0] = y.astype(y_ref.dtype)


def _run_out(gamma, attn, out0, x_nc, tn):
    B, N, Cr = out0.shape
    C = x_nc.shape[2]
    nt = N // tn
    grid_spec = pltpu.PrefetchScalarGridSpec(
        num_scalar_prefetch=0,
        grid=(B, nt),
        in_specs=[
            pl.BlockSpec(memory_space=pltpu.MemorySpace.SMEM),     # gamma (1,)
            pl.BlockSpec((1, Cr, C), lambda b, n: (b, 0, 0)),      # attn resident
            pl.BlockSpec((1, tn, Cr), lambda b, n: (b, n, 0)),     # out0 tile
            pl.BlockSpec((1, tn, C), lambda b, n: (b, n, 0)),      # x tile
        ],
        out_specs=pl.BlockSpec((1, tn, C), lambda b, n: (b, n, 0)),
    )
    return pl.pallas_call(
        _out_kernel,
        out_shape=jax.ShapeDtypeStruct((B, N, C), jnp.float32),
        grid_spec=grid_spec,
        compiler_params=pltpu.CompilerParams(
            dimension_semantics=("parallel", "parallel")),
    )(gamma, attn, out0, x_nc)


# ----------------------------------------------------------------------------
# Parameter folding: conv bias + BN affine -> one (scale, bias) per row,
# 1/N folded into the mid branch, segments zero-padded to multiples of 8 rows
# (so in-kernel splits are sublane-aligned), three weights concatenated.
# ----------------------------------------------------------------------------
def _fold_params(params, n_features, cr_p, c_p):
    def fold(w, cb, ns, nb, scale, rows_p):
        w_f = (ns * w) * scale
        b_f = (ns * cb + nb) * scale
        pad = rows_p - w_f.shape[0]
        if pad:
            w_f = jnp.pad(w_f, ((0, pad), (0, 0)))
            b_f = jnp.pad(b_f, ((0, pad), (0, 0)))
        return w_f, b_f

    wt, bt = fold(params["w_top"], params["cb_top"],
                  params["ns_top"], params["nb_top"], 1.0, cr_p)
    wm, bm = fold(params["w_mid"], params["cb_mid"],
                  params["ns_mid"], params["nb_mid"],
                  1.0 / float(n_features), cr_p)
    wb, bb = fold(params["w_bot"], params["cb_bot"],
                  params["ns_bot"], params["nb_bot"], 1.0, c_p)

    w_all = jnp.concatenate([wt, wm, wb], axis=0)    # (2*Cr_p + C_p, C)
    b_all = jnp.concatenate([bt, bm, bb], axis=0)    # (2*Cr_p + C_p, 1)
    return w_all, b_all


# ----------------------------------------------------------------------------
# Wrapper.  Glue reshapes are flat-order preserving (torch .reshape
# semantics) on contiguous buffers, so they are free HBM bitcasts.
# ----------------------------------------------------------------------------
@functools.partial(jax.jit, static_argnames=("n_tile", "use_bf16"))
def simple_self_attention(x, params, gamma, *, n_tile=None, use_bf16=False):
    B, C, H, W = x.shape
    N = H * W
    Cr = params["w_top"].shape[0]
    Cr_p = _round_up(Cr, 8)
    C_p = _round_up(C, 8)

    if n_tile is None:
        tn = N
        if N % 128 == 0:
            tn = 512
            while N % tn != 0:
                tn -= 128
    else:
        tn = n_tile
    assert N % tn == 0, "n_tile must divide H*W"

    cdt = jnp.bfloat16 if use_bf16 else x.dtype
    w_all, b_all = _fold_params(params, N, Cr_p, C_p)

    x_cn = x.reshape(B, C, N).astype(cdt)
    top, phi, bot = _run_branches(x_cn, w_all.astype(cdt), b_all,
                                  Cr, Cr_p, tn, cdt)

    theta = bot.reshape(B, N, C)       # torch .reshape(B, N, -1) of (B,C,H,W)
    out0 = top.reshape(B, N, Cr)       # torch .reshape(B, N, -1) of (B,Cr,H,W)
    x_nc = x_cn.reshape(B, N, C)       # same flat-order reinterpretation

    attn = _run_attn(phi, theta, tn)               # (B, Cr, C), includes 1/N
    y_nc = _run_out(gamma, attn, out0, x_nc, tn)   # (B, N, C), f32
    return y_nc.reshape(B, C, H, W)    # torch .reshape(B, -1, *spatial)


# ----------------------------------------------------------------------------
# Pure-JAX reference (mirrors the PyTorch forward exactly).
# ----------------------------------------------------------------------------
def reference(x, params, gamma):
    B, C, H, W = x.shape
    N = H * W
    xf = x.reshape(B, C, N)

    def cna(w, cb, ns, nb):
        y = jnp.einsum("oc,bcn->bon", w, xf) + cb[None]
        y = ns[None] * y + nb[None]
        return jnp.maximum(y, 0.0)

    top = cna(params["w_top"], params["cb_top"],
              params["ns_top"], params["nb_top"])
    mid = cna(params["w_mid"], params["cb_mid"],
              params["ns_mid"], params["nb_mid"])
    bot = cna(params["w_bot"], params["cb_bot"],
              params["ns_bot"], params["nb_bot"])

    phi = mid.reshape(B, -1, N)
    theta = bot.reshape(B, N, -1)
    attention = jnp.einsum("bij,bjk->bik", phi, theta) / N
    out = top.reshape(B, N, -1)
    out = jnp.einsum("bij,bjk->bik", out, attention).reshape(B, C, H, W)
    return gamma * out + x


# ----------------------------------------------------------------------------
if __name__ == "__main__":
    B, C, H, W = 2, 16, 16, 16
    ratio = 8
    Cr = C // ratio

    key = jax.random.PRNGKey(0)
    keys = jax.random.split(key, 8)

    x = jax.random.normal(keys[0], (B, C, H, W), dtype=jnp.float32)

    params = {
        # top branch: Block(channels='same//ratio') -> Cr output channels
        "w_top": 0.1 * jax.random.normal(keys[1], (Cr, C), jnp.float32),
        "cb_top": 0.05 * jax.random.normal(keys[2], (Cr, 1), jnp.float32),
        "ns_top": jnp.ones((Cr, 1), jnp.float32),
        "nb_top": jnp.zeros((Cr, 1), jnp.float32),
        # mid branch: same//ratio
        "w_mid": 0.1 * jax.random.normal(keys[3], (Cr, C), jnp.float32),
        "cb_mid": 0.05 * jax.random.normal(keys[4], (Cr, 1), jnp.float32),
        "ns_mid": jnp.ones((Cr, 1), jnp.float32),
        "nb_mid": jnp.zeros((Cr, 1), jnp.float32),
        # bot branch: 'same' -> C output channels
        "w_bot": 0.1 * jax.random.normal(keys[5], (C, C), jnp.float32),
        "cb_bot": 0.05 * jax.random.normal(keys[6], (C, 1), jnp.float32),
        "ns_bot": jnp.ones((C, 1), jnp.float32),
        "nb_bot": jnp.zeros((C, 1), jnp.float32),
    }
    # Module __init__ sets gamma = zeros(1); use a nonzero deterministic value
    # so the attention path actually contributes to the output.
    gamma = jnp.full((1,), 0.5, dtype=jnp.float32)

    y_ref = reference(x, params, gamma)

    # f32 path (tight tolerance).  n_tile=128 -> 4 parallel grid steps/kernel.
    y = simple_self_attention(x, params, gamma, n_tile=128)
    y = jax.block_until_ready(y)
    np.testing.assert_allclose(np.asarray(y), np.asarray(y_ref),
                               rtol=1e-4, atol=1e-4)

    # bf16-streamed path (f32 accumulation) — halves HBM bytes; looser
    # tolerance as recommended by the perf review.
    y_bf = simple_self_attention(x, params, gamma, n_tile=128, use_bf16=True)
    y_bf = jax.block_until_ready(y_bf)
    np.testing.assert_allclose(np.asarray(y_bf), np.asarray(y_ref),
                               rtol=3e-2, atol=3e-2)

    print("KERNEL_OK")
</pallas_src>

<mosaic_0001>
module attributes {stable_mosaic.version = 11 : i64} {
  func.func @_attn_kernel(%arg0: i32, %arg1: i32, %arg2: memref<1x2x128xf32, #tpu.memory_space<vmem>>, %arg3: memref<1x128x16xf32, #tpu.memory_space<vmem>>, %arg4: memref<1x2x16xf32, #tpu.memory_space<vmem>>) attributes {dimension_semantics = [#tpu.dimension_semantics<parallel>, #tpu.dimension_semantics<arbitrary>], iteration_bounds = array<i64: 2, 2>, scalar_prefetch = 0 : i64, scratch_operands = 0 : i64, tpu.core_type = #tpu.core_type<tc>, window_params = [{transform_indices = @transform_0, window_bounds = array<i64: 1, 2, 128>}, {transform_indices = @transform_1, window_bounds = array<i64: 1, 128, 16>}, {transform_indices = @transform_2, window_bounds = array<i64: 1, 2, 16>}]} {
    %c0_i32 = arith.constant 0 : i32
    %0 = arith.cmpi eq, %arg1, %c0_i32 : i32
    %1 = arith.extui %0 : i1 to i32
    %c0_i32_0 = arith.constant 0 : i32
    %2 = arith.cmpi ne, %1, %c0_i32_0 : i32
    scf.if %2 {
      %cst_12 = arith.constant 0.000000e+00 : f32
      %14 = vector.broadcast %cst_12 : f32 to vector<1x2x16xf32>
      %c0_13 = arith.constant 0 : index
      %c0_14 = arith.constant 0 : index
      %c0_15 = arith.constant 0 : index
      %15 = vector.load %arg4[%c0_13, %c0_14, %c0_15] : memref<1x2x16xf32, #tpu.memory_space<vmem>>, vector<1x2x16xf32>
      tpu.vector_store %arg4[%c0_13, %c0_14, %c0_15], %14 {strides = array<i32>} : memref<1x2x16xf32, #tpu.memory_space<vmem>>, vector<1x2x16xf32>,
    } else {
    }
    %c0 = arith.constant 0 : index
    %c0_1 = arith.constant 0 : index
    %c0_2 = arith.constant 0 : index
    %3 = vector.load %arg4[%c0, %c0_1, %c0_2] : memref<1x2x16xf32, #tpu.memory_space<vmem>>, vector<1x2x16xf32>
    %4 = vector.shape_cast %3 : vector<1x2x16xf32> to vector<2x16xf32>
    %c0_3 = arith.constant 0 : index
    %c0_4 = arith.constant 0 : index
    %c0_5 = arith.constant 0 : index
    %5 = vector.load %arg2[%c0_3, %c0_4, %c0_5] : memref<1x2x128xf32, #tpu.memory_space<vmem>>, vector<1x2x128xf32>
    %6 = vector.shape_cast %5 : vector<1x2x128xf32> to vector<2x128xf32>
    %c0_6 = arith.constant 0 : index
    %c0_7 = arith.constant 0 : index
    %c0_8 = arith.constant 0 : index
    %7 = vector.load %arg3[%c0_6, %c0_7, %c0_8] : memref<1x128x16xf32, #tpu.memory_space<vmem>>, vector<1x128x16xf32>
    %8 = vector.shape_cast %7 : vector<1x128x16xf32> to vector<128x16xf32>
    %cst = arith.constant dense<0.000000e+00> : vector<2x16xf32>
    %9 = tpu.matmul %6, %8, %cst {dimension_numbers = #tpu.dot_dimension_numbers<[1], [0], [0], [1], [0, 0, 1, 1], [], []>} : vector<2x128xf32>, vector<128x16xf32>, vector<2x16xf32> -> vector<2x16xf32>
    %10 = arith.addf %4, %9 : vector<2x16xf32>
    %c0_9 = arith.constant 0 : index
    %c0_10 = arith.constant 0 : index
    %c0_11 = arith.constant 0 : index
    %11 = vector.load %arg4[%c0_9, %c0_10, %c0_11] : memref<1x2x16xf32, #tpu.memory_space<vmem>>, vector<1x2x16xf32>
    %12 = vector.shape_cast %11 : vector<1x2x16xf32> to vector<2x16xf32>
    %13 = vector.shape_cast %10 : vector<2x16xf32> to vector<1x2x16xf32>
    tpu.vector_store %arg4[%c0_9, %c0_10, %c0_11], %13 {strides = array<i32>} : memref<1x2x16xf32, #tpu.memory_space<vmem>>, vector<1x2x16xf32>,
    return
  }
  func.func @transform_0(%arg0: i32, %arg1: i32) -> (i32, i32, i32) {
    %c0_i32 = arith.constant 0 : i32
    %c0_i32_0 = arith.constant 0 : i32
    return %arg0, %c0_i32, %arg1 : i32, i32, i32
  }
  func.func @transform_1(%arg0: i32, %arg1: i32) -> (i32, i32, i32) {
    %c0_i32 = arith.constant 0 : i32
    %c0_i32_0 = arith.constant 0 : i32
    return %arg0, %arg1, %c0_i32 : i32, i32, i32
  }
  func.func @transform_2(%arg0: i32, %arg1: i32) -> (i32, i32, i32) {
    %c0_i32 = arith.constant 0 : i32
    %c0_i32_0 = arith.constant 0 : i32
    %c0_i32_1 = arith.constant 0 : i32
    return %arg0, %c0_i32, %c0_i32_0 : i32, i32, i32
  }
}

module attributes {stable_mosaic.version = 11 : i64} {
  func.func @_branch_kernel(%arg0: i32, %arg1: i32, %arg2: memref<1x16x128xf32, #tpu.memory_space<vmem>>, %arg3: memref<32x16xf32, #tpu.memory_space<vmem>>, %arg4: memref<32x1xf32, #tpu.memory_space<vmem>>, %arg5: memref<1x2x128xf32, #tpu.memory_space<vmem>>, %arg6: memref<1x2x128xf32, #tpu.memory_space<vmem>>, %arg7: memref<1x16x128xf32, #tpu.memory_space<vmem>>) attributes {dimension_semantics = [#tpu.dimension_semantics<parallel>, #tpu.dimension_semantics<parallel>], iteration_bounds = array<i64: 2, 2>, scalar_prefetch = 0 : i64, scratch_operands = 0 : i64, tpu.core_type = #tpu.core_type<tc>, window_params = [{transform_indices = @transform_0, window_bounds = array<i64: 1, 16, 128>}, {pipeline_mode = #tpu.pipeline_mode<synchronous>, transform_indices = @transform_1, window_bounds = array<i64: 32, 16>}, {pipeline_mode = #tpu.pipeline_mode<synchronous>, transform_indices = @transform_2, window_bounds = array<i64: 32, 1>}, {transform_indices = @transform_3, window_bounds = array<i64: 1, 2, 128>}, {transform_indices = @transform_4, window_bounds = array<i64: 1, 2, 128>}, {transform_indices = @transform_5, window_bounds = array<i64: 1, 16, 128>}]} {
    %c0 = arith.constant 0 : index
    %c0_0 = arith.constant 0 : index
    %c0_1 = arith.constant 0 : index
    %0 = vector.load %arg2[%c0, %c0_0, %c0_1] : memref<1x16x128xf32, #tpu.memory_space<vmem>>, vector<1x16x128xf32>
    %1 = vector.shape_cast %0 : vector<1x16x128xf32> to vector<16x128xf32>
    %c0_2 = arith.constant 0 : index
    %c0_3 = arith.constant 0 : index
    %2 = vector.load %arg3[%c0_2, %c0_3] : memref<32x16xf32, #tpu.memory_space<vmem>>, vector<32x16xf32>
    %cst = arith.constant dense<0.000000e+00> : vector<32x128xf32>
    %3 = tpu.matmul %2, %1, %cst {dimension_numbers = #tpu.dot_dimension_numbers<[1], [0], [0], [1], [0, 0, 1, 1], [], []>} : vector<32x16xf32>, vector<16x128xf32>, vector<32x128xf32> -> vector<32x128xf32>
    %c0_4 = arith.constant 0 : index
    %c0_5 = arith.constant 0 : index
    %4 = vector.load %arg4[%c0_4, %c0_5] : memref<32x1xf32, #tpu.memory_space<vmem>>, vector<32x1xf32>
    %5 = vector.broadcast %4 : vector<32x1xf32> to vector<32x128xf32>
    %6 = arith.addf %3, %5 : vector<32x128xf32>
    %cst_6 = arith.constant 0.000000e+00 : f32
    %7 = vector.broadcast %cst_6 : f32 to vector<32x128xf32>
    %8 = arith.maximumf %6, %7 : vector<32x128xf32>
    %9 = vector.extract_strided_slice %8 {offsets = [0, 0], sizes = [2, 128], strides = [1, 1]} : vector<32x128xf32> to vector<2x128xf32>
    %c0_7 = arith.constant 0 : index
    %c0_8 = arith.constant 0 : index
    %c0_9 = arith.constant 0 : index
    %10 = vector.load %arg5[%c0_7, %c0_8, %c0_9] : memref<1x2x128xf32, #tpu.memory_space<vmem>>, vector<1x2x128xf32>
    %11 = vector.shape_cast %10 : vector<1x2x128xf32> to vector<2x128xf32>
    %12 = vector.shape_cast %9 : vector<2x128xf32> to vector<1x2x128xf32>
    tpu.vector_store %arg5[%c0_7, %c0_8, %c0_9], %12 {strides = array<i32>} : memref<1x2x128xf32, #tpu.memory_space<vmem>>, vector<1x2x128xf32>,
    %13 = vector.extract_strided_slice %8 {offsets = [8, 0], sizes = [2, 128], strides = [1, 1]} : vector<32x128xf32> to vector<2x128xf32>
    %c0_10 = arith.constant 0 : index
    %c0_11 = arith.constant 0 : index
    %c0_12 = arith.constant 0 : index
    %14 = vector.load %arg6[%c0_10, %c0_11, %c0_12] : memref<1x2x128xf32, #tpu.memory_space<vmem>>, vector<1x2x128xf32>
    %15 = vector.shape_cast %14 : vector<1x2x128xf32> to vector<2x128xf32>
    %16 = vector.shape_cast %13 : vector<2x128xf32> to vector<1x2x128xf32>
    tpu.vector_store %arg6[%c0_10, %c0_11, %c0_12], %16 {strides = array<i32>} : memref<1x2x128xf32, #tpu.memory_space<vmem>>, vector<1x2x128xf32>,
    %17 = vector.extract_strided_slice %8 {offsets = [16, 0], sizes = [16, 128], strides = [1, 1]} : vector<32x128xf32> to vector<16x128xf32>
    %c0_13 = arith.constant 0 : index
    %c0_14 = arith.constant 0 : index
    %c0_15 = arith.constant 0 : index
    %18 = vector.load %arg7[%c0_13, %c0_14, %c0_15] : memref<1x16x128xf32, #tpu.memory_space<vmem>>, vector<1x16x128xf32>
    %19 = vector.shape_cast %18 : vector<1x16x128xf32> to vector<16x128xf32>
    %20 = vector.shape_cast %17 : vector<16x128xf32> to vector<1x16x128xf32>
    tpu.vector_store %arg7[%c0_13, %c0_14, %c0_15], %20 {strides = array<i32>} : memref<1x16x128xf32, #tpu.memory_space<vmem>>, vector<1x16x128xf32>,
    return
  }
  func.func @transform_0(%arg0: i32, %arg1: i32) -> (i32, i32, i32) {
    %c0_i32 = arith.constant 0 : i32
    %c0_i32_0 = arith.constant 0 : i32
    return %arg0, %c0_i32, %arg1 : i32, i32, i32
  }
  func.func @transform_1(%arg0: i32, %arg1: i32) -> (i32, i32) {
    %c0_i32 = arith.constant 0 : i32
    %c0_i32_0 = arith.constant 0 : i32
    %c0_i32_1 = arith.constant 0 : i32
    return %c0_i32, %c0_i32_0 : i32, i32
  }
  func.func @transform_2(%arg0: i32, %arg1: i32) -> (i32, i32) {
    %c0_i32 = arith.constant 0 : i32
    %c0_i32_0 = arith.constant 0 : i32
    %c0_i32_1 = arith.constant 0 : i32
    return %c0_i32, %c0_i32_0 : i32, i32
  }
  func.func @transform_3(%arg0: i32, %arg1: i32) -> (i32, i32, i32) {
    %c0_i32 = arith.constant 0 : i32
    %c0_i32_0 = arith.constant 0 : i32
    return %arg0, %c0_i32, %arg1 : i32, i32, i32
  }
  func.func @transform_4(%arg0: i32, %arg1: i32) -> (i32, i32, i32) {
    %c0_i32 = arith.constant 0 : i32
    %c0_i32_0 = arith.constant 0 : i32
    return %arg0, %c0_i32, %arg1 : i32, i32, i32
  }
  func.func @transform_5(%arg0: i32, %arg1: i32) -> (i32, i32, i32) {
    %c0_i32 = arith.constant 0 : i32
    %c0_i32_0 = arith.constant 0 : i32
    return %arg0, %c0_i32, %arg1 : i32, i32, i32
  }
}

module attributes {stable_mosaic.version = 11 : i64} {
  func.func @_out_kernel(%arg0: i32, %arg1: i32, %arg2: memref<1xf32, #tpu.memory_space<smem>>, %arg3: memref<1x2x16xf32, #tpu.memory_space<vmem>>, %arg4: memref<1x128x2xf32, #tpu.memory_space<vmem>>, %arg5: memref<1x128x16xf32, #tpu.memory_space<vmem>>, %arg6: memref<1x128x16xf32, #tpu.memory_space<vmem>>) attributes {dimension_semantics = [#tpu.dimension_semantics<parallel>, #tpu.dimension_semantics<parallel>], iteration_bounds = array<i64: 2, 2>, scalar_prefetch = 0 : i64, scratch_operands = 0 : i64, tpu.core_type = #tpu.core_type<tc>, window_params = [{transform_indices = @transform_0, window_bounds = array<i64: 1>}, {transform_indices = @transform_1, window_bounds = array<i64: 1, 2, 16>}, {transform_indices = @transform_2, window_bounds = array<i64: 1, 128, 2>}, {transform_indices = @transform_3, window_bounds = array<i64: 1, 128, 16>}, {transform_indices = @transform_4, window_bounds = array<i64: 1, 128, 16>}]} {
    %c0 = arith.constant 0 : index
    %c0_0 = arith.constant 0 : index
    %c0_1 = arith.constant 0 : index
    %0 = vector.load %arg3[%c0, %c0_0, %c0_1] : memref<1x2x16xf32, #tpu.memory_space<vmem>>, vector<1x2x16xf32>
    %1 = vector.shape_cast %0 : vector<1x2x16xf32> to vector<2x16xf32>
    %c0_2 = arith.constant 0 : index
    %c0_3 = arith.constant 0 : index
    %c0_4 = arith.constant 0 : index
    %2 = vector.load %arg4[%c0_2, %c0_3, %c0_4] : memref<1x128x2xf32, #tpu.memory_space<vmem>>, vector<1x128x2xf32>
    %3 = vector.shape_cast %2 : vector<1x128x2xf32> to vector<128x2xf32>
    %cst = arith.constant dense<0.000000e+00> : vector<128x16xf32>
    %4 = tpu.matmul %3, %1, %cst {dimension_numbers = #tpu.dot_dimension_numbers<[1], [0], [0], [1], [0, 0, 1, 1], [], []>} : vector<128x2xf32>, vector<2x16xf32>, vector<128x16xf32> -> vector<128x16xf32>
    %c0_5 = arith.constant 0 : index
    %5 = memref.load %arg2[%c0_5] : memref<1xf32, #tpu.memory_space<smem>>
    %6 = vector.broadcast %5 : f32 to vector<128x16xf32>
    %7 = arith.mulf %6, %4 : vector<128x16xf32>
    %c0_6 = arith.constant 0 : index
    %c0_7 = arith.constant 0 : index
    %c0_8 = arith.constant 0 : index
    %8 = vector.load %arg5[%c0_6, %c0_7, %c0_8] : memref<1x128x16xf32, #tpu.memory_space<vmem>>, vector<1x128x16xf32>
    %9 = vector.shape_cast %8 : vector<1x128x16xf32> to vector<128x16xf32>
    %10 = arith.addf %7, %9 : vector<128x16xf32>
    %c0_9 = arith.constant 0 : index
    %c0_10 = arith.constant 0 : index
    %c0_11 = arith.constant 0 : index
    %11 = vector.load %arg6[%c0_9, %c0_10, %c0_11] : memref<1x128x16xf32, #tpu.memory_space<vmem>>, vector<1x128x16xf32>
    %12 = vector.shape_cast %11 : vector<1x128x16xf32> to vector<128x16xf32>
    %13 = vector.shape_cast %10 : vector<128x16xf32> to vector<1x128x16xf32>
    tpu.vector_store %arg6[%c0_9, %c0_10, %c0_11], %13 {strides = array<i32>} : memref<1x128x16xf32, #tpu.memory_space<vmem>>, vector<1x128x16xf32>,
    return
  }
  func.func @transform_0(%arg0: i32, %arg1: i32) -> i32 {
    %c0_i32 = arith.constant 0 : i32
    %c0_i32_0 = arith.constant 0 : i32
    return %c0_i32 : i32
  }
  func.func @transform_1(%arg0: i32, %arg1: i32) -> (i32, i32, i32) {
    %c0_i32 = arith.constant 0 : i32
    %c0_i32_0 = arith.constant 0 : i32
    %c0_i32_1 = arith.constant 0 : i32
    return %arg0, %c0_i32, %c0_i32_0 : i32, i32, i32
  }
  func.func @transform_2(%arg0: i32, %arg1: i32) -> (i32, i32, i32) {
    %c0_i32 = arith.constant 0 : i32
    %c0_i32_0 = arith.constant 0 : i32
    return %arg0, %arg1, %c0_i32 : i32, i32, i32
  }
  func.func @transform_3(%arg0: i32, %arg1: i32) -> (i32, i32, i32) {
    %c0_i32 = arith.constant 0 : i32
    %c0_i32_0 = arith.constant 0 : i32
    return %arg0, %arg1, %c0_i32 : i32, i32, i32
  }
  func.func @transform_4(%arg0: i32, %arg1: i32) -> (i32, i32, i32) {
    %c0_i32 = arith.constant 0 : i32
    %c0_i32_0 = arith.constant 0 : i32
    return %arg0, %arg1, %c0_i32 : i32, i32, i32
  }
}

</mosaic_0001>

<bundles_post_ra>
// kernel: simple_self_attention.4
= control target key start
LH: loop header
LB: loop body
LE: loop exit
PB: predicated region body
PF: predicated region fallthrough
CT: control target
= control target key end

     0   :  { %s447_s9 = smov 0   ;;  %s449_s10 = smov 0   ;;  %s533_s0 = inlined_call_operand.vmem [shape: f32[2,2,256], index: 0, kind: input, shape index: {}]   ;;  %s534_s1 = inlined_call_operand.vmem [shape: f32[2,256,16], index: 1, kind: input, shape index: {}]   ;;  %s535_s2 = inlined_call_operand.vmem [shape: f32[2,2,16], index: 2, kind: output, shape index: {}]  }
   0x1   :  { %s451_s11 = smov 0   ;;  %s453_s12 = smov 0  }
   0x2   :  { %s455_s13 = smov 0  }
   0x3 LB: > { %s21_s14 = sadd.s32 1, %s421_s11  ;;  %s24_s15 = sadd.s32 1, %s425_s12  ;;  %s429_s13 = sphi %s455_s13, %s12_s13   ;;  %s425_s12 = sphi %s453_s12, %s539_s12   ;;  %s421_s11 = sphi %s451_s11, %s538_s11   ;;  %s417_s10 = sphi %s449_s10, %s537_s10   ;;  %s413_s9 = sphi %s447_s9, %s536_s9  }
   0x4   : > { %p22_p0 = scmp.ge.s32.totalorder %s21_s14, 2  ;;  %p340_p1 = scmp.ge.s32.totalorder %s429_s13, 1 }
   0x5   : > { %p146_p2 = scmp.lt.s32.totalorder %s429_s13, 5 }
   0x6   : > { %s541_s14 = smov (%p22_p0, %s21_s14), 0  ;;  %s543_s15 = smov (!%p22_p0, %s24_s15), %s425_s12 }
   0x7   : > { %p147_p3 = pnand %p340_p1, %p146_p2  ;;  %p26_p4 = scmp.ge.s32.totalorder %s543_s15, 2 }
   0x8   : > { %p179_p5 = scmp.lt.s32.totalorder (!%p147_p3), %s417_s10, 1  ;;  %p181_p6 = scmp.lt.s32.totalorder (!%p147_p3), %s413_s9, 1 }
   0x9   : > { %s545_s15 = smov (%p26_p4, %s543_s15), 0  ;;  %150 = sbr.rel (%p147_p3) target bundleno = 188 (0xbc), region = 28 }
   0xa   : > { %s343_s16 = sshll.u32 (!%p147_p3), %s413_s9, 4  ;;  %p347_p8 = scmp.ne.s32.totalorder (!%p147_p3), %s413_s9, 0 }
   0xb   : > { %p190_p7 = scmp.lt.s32.totalorder (!%p147_p3), %s343_s16, 31 }
   0xe   : > { %s547_s10 = smov (!%p179_p5, %s417_s10), 1  ;;  %s549_s16 = smov (!%p190_p7, %s343_s16), 31 }
   0xf   : > { %s182_s17 = scalar_select %p181_p6, %s413_s9, 1 }
  0x10   : > { %s341_s18 = sshll.u32 %s547_s10, 1  ;;  %s344_s27 = sshll.u32 %s547_s10, 5 }
  0x11   : > { %s184_s19 = sadd.s32 %s341_s18, %s182_s17  ;;  %s485_s23 = scalar_lea.vmem %s535_s2, %s341_s18 }
  0x12   : > { %s342_s20 = sshll.u32 %s184_s19, 1  ;;  %s193_s28 = sadd.s32 %s344_s27, %s549_s16 }
  0x13   : > { %s490_s26 = scalar_lea.vmem %s533_s0, %s342_s20  ;;  %s345_s29 = sshll.u32 %s193_s28, 3 }
  0x14   : > { %s495_s4 = scalar_lea.vmem %s534_s1, %s345_s29  ;;  %204 = sbr.rel (%p347_p8) target bundleno = 27 (0x1b), region = 32 }
  0x19   : > { %vm205_vm0 = vcmask 123904   ;;  %v431_v0 = vmov 0.0  }
  0x1a   : > { %206 = vst.msk [vmem:[%s485_s23] sm:$0x3] %vm205_vm0, %v431_v0 }
  0x1b PF: > { %v224_v1 = vld [vmem:[%s495_s4 + $0x78] sm:$0xff]  ;;  %v223_v2 = vld [vmem:[%s495_s4 + $0x70] sm:$0xff]  ;;  %v222_v3 = vld [vmem:[%s495_s4 + $0x68] sm:$0xff]  ;;  %vm246_vm1 = vcmask 123904  }
  0x1c   : > { %225 = vmatpush.msra.mxu0 %v224_v1  ;;  %v221_v4 = vld [vmem:[%s495_s4 + $0x60] sm:$0xff]  ;;  %v220_v5 = vld [vmem:[%s495_s4 + $0x58] sm:$0xff]  ;;  %v219_v6 = vld [vmem:[%s495_s4 + $0x50] sm:$0xff] }
  0x1d   : > { %v218_v7 = vld [vmem:[%s495_s4 + $0x48] sm:$0xff]  ;;  %v217_v8 = vld [vmem:[%s495_s4 + $0x40] sm:$0xff]  ;;  %v216_v9 = vld [vmem:[%s495_s4 + $0x38] sm:$0xff] }
  0x1e   : > { %226 = vmatpush.msra.mxu0 %v223_v2  ;;  %v215_v10 = vld [vmem:[%s495_s4 + $0x30] sm:$0xff]  ;;  %v214_v11 = vld [vmem:[%s495_s4 + $0x28] sm:$0xff]  ;;  %v213_v12 = vld [vmem:[%s495_s4 + $0x20] sm:$0xff] }
  0x1f   : > { %v212_v13 = vld [vmem:[%s495_s4 + $0x18] sm:$0xff]  ;;  %v211_v14 = vld [vmem:[%s495_s4 + $0x10] sm:$0xff]  ;;  %v210_v15 = vld [vmem:[%s495_s4 + $0x8] sm:$0xff] }
  0x20   : > { %227 = vmatpush.msra.mxu0 %v222_v3  ;;  %v209_v16 = vld [vmem:[%s495_s4] sm:$0xff] }
  0x21   : > { %v208_v17 = vld [vmem:[%s490_s26] sm:$0x3] }
  0x22   : > { %228 = vmatpush.msra.mxu0 %v221_v4  ;;  %v207_v18 = vld [vmem:[%s485_s23] sm:$0x3] }
  0x24   : > { %229 = vmatpush.msra.mxu0 %v220_v5 }
  0x26   : > { %230 = vmatpush.msra.mxu0 %v219_v6 }
  0x28   : > { %231 = vmatpush.msra.mxu0 %v218_v7 }
  0x2a   : > { %232 = vmatpush.msra.mxu0 %v217_v8 }
  0x2c   : > { %233 = vmatpush.msra.mxu0 %v216_v9 }
  0x2e   : > { %234 = vmatpush.msra.mxu0 %v215_v10 }
  0x30   : > { %235 = vmatpush.msra.mxu0 %v214_v11 }
  0x32   : > { %236 = vmatpush.msra.mxu0 %v213_v12 }
  0x34   : > { %237 = vmatpush.msra.mxu0 %v212_v13 }
  0x36   : > { %238 = vmatpush.msra.mxu0 %v211_v14 }
  0x38   : > { %239 = vmatpush.msra.mxu0 %v210_v15 }
  0x3a   : > { %240 = vmatpush.msra.mxu0 %v209_v16 }
  0x3b   : > { %241 = vmatmul.f32.vlgmr.msra.gmra.mxu0 %v208_v17 }
  0xb8   : > { %v242_v19 = vpop.f32.mrf.mxu0 }
  0xb9   : > { %v245_v20 = vadd.f32 %v242_v19, %v207_v18 }
  0xbb   : > { %247 = vst.msk [vmem:[%s485_s23] sm:$0x3] %vm246_vm1, %v245_v20 }
  0xbc PF: > { %s12_s13 = sadd.s32 1, %s429_s13   ;;  %s536_s9 = smov %s421_s11 }
  0xbd   : > { %p9_p9 = scmp.ge.s32.totalorder %s12_s13, 6   ;;  %s537_s10 = smov %s425_s12 }
  0xbe   : > { %s538_s11 = smov %s541_s14  ;;  %s539_s12 = smov %s545_s15 }
  0xbf   :  { %11 = sbr.rel (!%p9_p9) target bundleno = 3 (0x3), region = 65 }

// kernel: simple_self_attention.3
= control target key start
LH: loop header
LB: loop body
LE: loop exit
PB: predicated region body
PF: predicated region fallthrough
CT: control target
= control target key end

     0   :  { %s786_s18 = smov 0   ;;  %s788_s19 = smov 0   ;;  %s920_s0 = inlined_call_operand.vmem [shape: f32[2,16,256], index: 0, kind: input, shape index: {}]   ;;  %s921_s1 = inlined_call_operand.vmem [shape: f32[32,16], index: 1, kind: input, shape index: {}]   ;;  %s922_s2 = inlined_call_operand.vmem [shape: f32[32,1], index: 2, kind: input, shape index: {}]   ;;  %s923_s3 = inlined_call_operand.vmem [shape: f32[2,2,256], index: 3, kind: output, shape index: {0}]   ;;  %s924_s4 = inlined_call_operand.vmem [shape: f32[2,2,256], index: 4, kind: output, shape index: {1}]   ;;  %s925_s5 = inlined_call_operand.vmem [shape: f32[2,16,256], index: 5, kind: output, shape index: {2}]  }
   0x1   :  { %s790_s20 = smov 0   ;;  %s792_s21 = smov 0  }
   0x2   :  { %s794_s22 = smov 0   ;;  %s796_s23 = smov 0  }
   0x3   :  { %s798_s24 = smov 0  }
   0x4 LB: > { %s25_s25 = sadd.s32 1, %s745_s22  ;;  %s28_s26 = sadd.s32 1, %s749_s23  ;;  %s753_s24 = sphi %s798_s24, %s16_s24   ;;  %s749_s23 = sphi %s796_s23, %s932_s23   ;;  %s745_s22 = sphi %s794_s22, %s931_s22   ;;  %s741_s21 = sphi %s792_s21, %s930_s21   ;;  %s737_s20 = sphi %s790_s20, %s929_s20   ;;  %s733_s19 = sphi %s788_s19, %s928_s19   ;;  %s729_s18 = sphi %s786_s18, %s927_s18  }
   0x5   : > { %p26_p0 = scmp.ge.s32.totalorder %s25_s25, 2  ;;  %s611_s27 = sadd.s32 4294967295, %s753_s24  }
   0x6   : > { %p44_p1 = scmp.ne.s32.totalorder %s733_s19, %s729_s18  ;;  %p45_p2 = scmp.eq.s32.totalorder %s753_s24, 0 }
   0x7   : > { %s934_s25 = smov (%p26_p0, %s25_s25), 0  ;;  %s936_s26 = smov (!%p26_p0, %s28_s26), %s749_s23 }
   0x8   : > { %p30_p3 = scmp.ge.s32.totalorder %s936_s26, 2  ;;  %p174_p4 = scmp.eq.s32.totalorder %s611_s27, 3 }
   0x9   : > { %s33_s28 = ssub.s32 %s745_s22, %s934_s25  ;;  %p46_p5 = por %p45_p2, %p44_p1 }
   0xa   : > { %s938_s26 = smov (%p30_p3, %s936_s26), 0  ;;  %p834_p6 = por %p174_p4, %p44_p1 }
   0xb   : > { %s32_s30 = ssub.s32 %s749_s23, %s938_s26  ;;  %s37_s7 = sadd.s32 1, %s733_s19 }
   0xc   : > { %s34_s6 = sor.u32 %s33_s28, %s32_s30  ;;  %p614_p8 = scmp.ge.s32.totalorder %s753_s24, 4 }
   0xd   : > { %p35_p7 = scmp.eq.s32.totalorder %s34_s6, 0 }
   0xe   : > { %202 = sbr.rel (%p614_p8) target bundleno = 27 (0x1b), region = 24 }
   0xf   : > { %s842_s8 = scalar_select %p35_p7, %s733_s19, %s37_s7  }
  0x13   : > { %205 = sbr.rel (!%p46_p5) target bundleno = 27 (0x1b), region = 28  ;;  %s207_s9 = sand.u32 (%p46_p5), 1, %s733_s19  }
  0x14   : > { %s616_s10 = sshll.u32 (%p46_p5), %s749_s23, 2  ;;  %s615_s11 = sshll.u32 (%p46_p5), %s207_s9, 4 }
  0x15   : > { %s211_s12 = sadd.s32 (%p46_p5), %s745_s22, %s616_s10  ;;  %s209_s17 = scalar_lea.vmem (%p46_p5), [#allocation2], %s615_s11 }
  0x16   : > { %s617_s13 = sshll.u32 (%p46_p5), %s211_s12, 3 }
  0x17   : > { %s213_s16 = scalar_lea.vmem (%p46_p5), %s920_s0, %s617_s13 }
  0x18   : > { %v244_v0 = vld [vmem:[%s213_s16] sm:$0xff]  ;;  %v246_v1 = vld [vmem:[%s213_s16 + $0x10] sm:$0xff] }
  0x19   : > { %245 = vst [vmem:[%s209_s17] sm:$0xff] %v244_v0 }
  0x1a   : > { %247 = vst [vmem:[%s209_s17 + $0x8] sm:$0xff] %v246_v1 }
  0x1b PF: > { %p618_p9 = scmp.ge.s32.totalorder %s753_s24, 1  ;;  %p252_p10 = scmp.lt.s32.totalorder %s753_s24, 5 }
  0x1d   : > { %p253_p11 = pnand %p618_p9, %p252_p10 }
  0x1e   : > { %s259_s27 = sand.u32 (!%p253_p11), 1, %s729_s18   ;;  %p301_p12 = scmp.lt.s32.totalorder (!%p253_p11), %s741_s21, 1 }
  0x1f   : > { %256 = sbr.rel (%p253_p11) target bundleno = 190 (0xbe), region = 66  ;;  %s854_s28 = sshll.u32 (!%p253_p11), %s259_s27, 4 }
  0x20   : > { %s261_s10 = scalar_lea.vmem (!%p253_p11), [#allocation2], %s854_s28  ;;  %p303_p13 = scmp.lt.s32.totalorder (!%p253_p11), %s737_s20, 1 }
  0x21   : > { %s300_s30 = scalar_lea.vmem (!%p253_p11), [#allocation3], %s854_s28 }
  0x24   : > { %v755_v2 = vmov 0   ;;  %v325_v3 = vld [vmem:[%s922_s2 + $0x10] sm:$0xff]  ;;  %v323_v4 = vld [vmem:[%s922_s2] sm:$0xff]  ;;  %v318_v5 = vld [vmem:[%s261_s10 + $0x8] sm:$0xff]  ;;  %vm347_vm0 = vcmask 130048   ;;  %s302_s9 = scalar_select %p301_p12, %s741_s21, 1 }
  0x25   : > { %698 = vset.pattern.permute.xlu1 %v755_v2  ;;  %697 = vset.pattern.permute.xlu0 %v755_v2  ;;  %v317_v6 = vld [vmem:[%s261_s10] sm:$0xff]  ;;  %v320_v8 = vld [vmem:[%s921_s1 + $0x8] sm:$0xff]  ;;  %v322_v10 = vld [vmem:[%s921_s1 + $0x18] sm:$0xff]  ;;  %s304_s10 = scalar_select %p303_p13, %s737_s20, 1 }
  0x26   : > { %339 = vperm.xlu1 %698, %v325_v3   ;;  %329 = vperm.xlu0 %697, %v323_v4   ;;  %v319_v7 = vld [vmem:[%s921_s1] sm:$0xff]  ;;  %v321_v9 = vld [vmem:[%s921_s1 + $0x10] sm:$0xff]  ;;  %v326_v11 = vld [vmem:[%s922_s2 + $0x18] sm:$0xff]  ;;  %s621_s18 = sshll.u32 %s302_s9, 1  ;;  %s630_s6 = sshll.u32 (%p834_p6), %s741_s21, 2 }
  0x27   : > { %374 = vmatpush.msra.mxu0 %v318_v5  ;;  %634 = vmatpush.msra.mxu1 %v318_v5  ;;  %v324_v12 = vld [vmem:[%s922_s2 + $0x8] sm:$0xff]  ;;  %s306_s11 = sadd.s32 %s621_s18, %s304_s10  ;;  %s427_s7 = sadd.s32 (%p834_p6), %s737_s20, %s630_s6 }
  0x28   : > { %635 = vmatpush.msra.mxu2 %v318_v5  ;;  %636 = vmatpush.msra.mxu3 %v318_v5  ;;  %s622_s12 = sshll.u32 %s306_s11, 1  ;;  %s631_s9 = sshll.u32 (%p834_p6), %s427_s7, 3 }
  0x29   : > { %375 = vmatpush.msra.mxu0 %v317_v6  ;;  %637 = vmatpush.msra.mxu1 %v317_v6  ;;  %s308_s15 = scalar_lea.vmem %s923_s3, %s622_s12  ;;  %s316_s27 = scalar_lea.vmem %s924_s4, %s622_s12 }
  0x2a   : > { %638 = vmatpush.msra.mxu2 %v317_v6  ;;  %639 = vmatpush.msra.mxu3 %v317_v6  ;;  %s429_s11 = scalar_lea.vmem (%p834_p6), %s925_s5, %s631_s9 }
  0x2b   : > { %625 = vmatmul.msk.f32.vlgmr.msra.gmra.mxu0 %vm347_vm0, %v319_v7  ;;  %626 = vmatmul.msk.f32.vlgmr.msra.gmra.mxu1 %vm347_vm0, %v320_v8 }
  0x2c   : > { %627 = vmatmul.msk.f32.vlgmr.msra.gmra.mxu2 %vm347_vm0, %v321_v9  ;;  %628 = vmatmul.msk.f32.vlgmr.msra.gmra.mxu3 %vm347_vm0, %v322_v10 }
  0x2e   : > { %344 = vperm.xlu1 %698, %v326_v11   ;;  %334 = vperm.xlu0 %697, %v324_v12  }
  0x98   : > { %v330_v13 = vpop.permute.xlu0 %329  ;;  %v340_v14 = vpop.permute.xlu1 %339 }
  0xa0   : > { %v335_v15 = vpop.permute.xlu0 %334  ;;  %v345_v22 = vpop.permute.xlu1 %344 }
  0xa8   : > { %v377_v16 = vpop.f32.mrf.mxu0  ;;  %v380_v17 = vpop.f32.mrf.mxu1 }
  0xa9   : > { %v378_v18 = vadd.f32 %v377_v16, %v330_v13  ;;  %v381_v19 = vadd.f32 %v380_v17, %v335_v15 }
  0xab   : > { %v389_v20 = vmax.f32 %v378_v18, 0.0  ;;  %v390_v21 = vmax.f32 %v381_v19, 0.0 }
  0xad   : > { %393 = vst [vmem:[%s308_s15] sm:$0x3] %v389_v20 }
  0xae   : > { %394 = vst [vmem:[%s316_s27] sm:$0x3] %v390_v21 }
  0xaf   : > { %v383_v23 = vpop.f32.mrf.mxu2  ;;  %v386_v24 = vpop.f32.mrf.mxu3 }
  0xb0   : > { %v384_v25 = vadd.f32 %v383_v23, %v340_v14  ;;  %v387_v26 = vadd.f32 %v386_v24, %v345_v22 }
  0xb1   : > { %425 = sbr.rel (!%p834_p6) target bundleno = 190 (0xbe), region = 82 }
  0xb2   : > { %v391_v27 = vmax.f32 %v384_v25, 0.0  ;;  %v392_v28 = vmax.f32 %v387_v26, 0.0 }
  0xb4   : > { %395 = vst [vmem:[%s300_s30] sm:$0xff] %v391_v27 }
  0xb5   : > { %396 = vst [vmem:[%s300_s30 + $0x8] sm:$0xff] %v392_v28 }
  0xbb   : > { %v460_v29 = vld [vmem:[%s300_s30] sm:$0xff] }
  0xbc   : > { %v462_v30 = vld [vmem:[%s300_s30 + $0x8] sm:$0xff]  ;;  %461 = vst [vmem:[%s429_s11] sm:$0xff] %v460_v29 }
  0xbd   : > { %463 = vst [vmem:[%s429_s11 + $0x10] sm:$0xff] %v462_v30 }
  0xbe PF: > { %s16_s24 = sadd.s32 1, %s753_s24   ;;  %s927_s18 = smov %s733_s19 }
  0xbf   : > { %p13_p0 = scmp.ge.s32.totalorder %s16_s24, 6   ;;  %s928_s19 = smov %s842_s8 }
  0xc0   : > { %s929_s20 = smov %s745_s22  ;;  %s930_s21 = smov %s749_s23 }
  0xc1   : > { %s931_s22 = smov %s934_s25  ;;  %s932_s23 = smov %s938_s26 }
  0xc2   :  { %15 = sbr.rel (!%p13_p0) target bundleno = 4 (0x4), region = 167 }

// kernel: simple_self_attention.5
= control target key start
LH: loop header
LB: loop body
LE: loop exit
PB: predicated region body
PF: predicated region fallthrough
CT: control target
= control target key end

     0   :  { %s1098_s0 = inlined_call_operand.<no memory space> [shape: f32[1], index: 0, kind: input, shape index: {}]   ;;  %s1099_s1 = inlined_call_operand.vmem [shape: f32[2,2,16], index: 1, kind: input, shape index: {}]   ;;  %s1100_s2 = inlined_call_operand.vmem [shape: f32[2,256,2], index: 2, kind: input, shape index: {}]   ;;  %s1101_s3 = inlined_call_operand.vmem [shape: f32[2,256,16], index: 3, kind: input, shape index: {}]   ;;  %s1102_s4 = inlined_call_operand.hbm [shape: f32[2,256,16], index: 4, kind: output, shape index: {}]  }
   0x1   :  { %9 = sst [smem:[#allocation2]] %s1098_s0 }
   0x2   :  { %10 = vsyncpa [#allocation4], 0 }
   0x3   :  { %12 = vsyncpa [#allocation4 + $0x1], 0  ;;  %s851_s17 = smov 0   ;;  %s853_s18 = smov 0  }
   0x4   :  { %s855_s19 = smov 0   ;;  %s857_s20 = smov 0  }
   0x5   :  { %s859_s21 = smov 0   ;;  %s861_s22 = smov 0  }
   0x6   :  { %s863_s23 = smov 0   ;;  %s865_s24 = smov 0  }
   0x7 LB: > { %s613_s0 = sadd.s32 4294967295, %s819_s24   ;;  %s614_s25 = sadd.s32 4294967294, %s819_s24   ;;  %s819_s24 = sphi %s865_s24, %s18_s24   ;;  %s815_s23 = sphi %s863_s23, %s1111_s23   ;;  %s811_s22 = sphi %s861_s22, %s1110_s22   ;;  %s807_s21 = sphi %s859_s21, %s1109_s21   ;;  %s803_s20 = sphi %s857_s20, %s1108_s20   ;;  %s799_s19 = sphi %s855_s19, %s1107_s19   ;;  %s795_s18 = sphi %s853_s18, %s1106_s18   ;;  %s791_s17 = sphi %s851_s17, %s1105_s17  }
   0x8   : > { %s27_s26 = sadd.s32 1, %s811_s22  ;;  %s30_s27 = sadd.s32 1, %s815_s23 }
   0x9   : > { %p28_p0 = scmp.ge.s32.totalorder %s27_s26, 2  ;;  %p152_p1 = scmp.ne.s32.totalorder %s799_s19, %s795_s18 }
   0xa   : > { %p153_p2 = scmp.eq.s32.totalorder %s613_s0, 3  ;;  %p158_p5 = scmp.ne.s32.totalorder %s795_s18, %s791_s17 }
   0xb   : > { %s1113_s26 = smov (%p28_p0, %s27_s26), 0  ;;  %s1115_s27 = smov (!%p28_p0, %s30_s27), %s815_s23 }
   0xc   : > { %s138_s28 = ssub.s32 %s811_s22, %s1113_s26  ;;  %p902_p3 = por %p153_p2, %p152_p1 }
   0xd   : > { %p32_p4 = scmp.ge.s32.totalorder %s1115_s27, 2  ;;  %p159_p6 = scmp.eq.s32.totalorder %s614_s25, 3 }
   0xe   : > { %p617_p7 = scmp.ge.s32.totalorder %s819_s24, 1  ;;  %p213_p9 = scmp.lt.s32.totalorder %s819_s24, 5 }
   0xf   : > { %s1117_s27 = smov (%p32_p4, %s1115_s27), 0  ;;  %p911_p8 = por %p159_p6, %p158_p5 }
  0x10   : > { %s137_s5 = ssub.s32 %s815_s23, %s1117_s27  ;;  %s142_s6 = sadd.s32 1, %s799_s19 }
  0x11   : > { %s139_s7 = sor.u32 %s138_s28, %s137_s5  ;;  %p214_p10 = pnand %p617_p7, %p213_p9 }
  0x12   : > { %p140_p11 = scmp.eq.s32.totalorder %s139_s7, 0  ;;  %p256_p12 = scmp.lt.s32.totalorder (!%p214_p10), %s807_s21, 1 }
  0x13   : > { %217 = sbr.rel (%p214_p10) target bundleno = 196 (0xc4), region = 36  ;;  %s924_s9 = sshll.u32 (!%p214_p10), %s803_s20, 4 }
  0x14   : > { %s920_s8 = scalar_select %p140_p11, %s799_s19, %s142_s6  }
  0x15   : > { %p263_p13 = scmp.lt.s32.totalorder (!%p214_p10), %s924_s9, 31  ;;  %s416_s6 = sld [smem:[#allocation2]] (!%p214_p10) }
  0x16   : > { %s253_s7 = sand.u32 (!%p214_p10), 1, %s795_s18   ;;  %s645_s15 = sshll.u32 (!%p214_p10), %s807_s21, 5 }
  0x18   : > { %s257_s10 = scalar_select %p256_p12, %s807_s21, 1  ;;  %vm347_vm0 = vcmask 1041408   ;;  %vm298_vm1 = vcmask 15360   ;;  %vm466_vm2 = vcmask 130048  }
  0x19   : > { %s264_s11 = scalar_select %p263_p13, %s924_s9, 31 }
  0x1a   : > { %s619_s12 = sshll.u32 %s257_s10, 1  ;;  %s621_s13 = sshll.u32 %s257_s10, 5 }
  0x1b   : > { %s259_s16 = scalar_lea.vmem %s1099_s1, %s619_s12  ;;  %s932_s0 = sadd.s32 %s621_s13, %s264_s11  ;;  %v982_v17 = vstv %s416_s6 }
  0x1c   : > { %s622_s25 = sshll.u32 %s932_s0, 3  ;;  %v281_v0 = vld [vmem:[%s259_s16] sm:$0x3]  ;;  %s618_s13 = sshll.u32 %s253_s7, 7 }
  0x1d   : > { %s940_s5 = scalar_lea.vmem %s1100_s2, %s622_s25  ;;  %650 = vmatpush.msk.msra.mxu2 %vm347_vm0, %v281_v0  ;;  %651 = vmatpush.msk.msra.mxu3 %vm347_vm0, %v281_v0  ;;  %s980_s12 = scalar_lea.vmem %s1101_s3, %s622_s25 }
  0x1e   : > { %v290_v1 = vld [vmem:[%s940_s5 + $0x40] sm:$0xff]  ;;  %626 = vmatpush.msk.msra.mxu0 %vm347_vm0, %v281_v0  ;;  %649 = vmatpush.msk.msra.mxu1 %vm347_vm0, %v281_v0  ;;  %v291_v5 = vld [vmem:[%s940_s5 + $0x48] sm:$0xff]  ;;  %v292_v9 = vld [vmem:[%s940_s5 + $0x50] sm:$0xff]  ;;  %s990_s14 = scalar_lea.vmem [#allocation3], %s618_s13  ;;  %s495_s16 = sadd.s32 %s645_s15, %s924_s9 }
  0x1f   : > { %v294_v2 = vld [vmem:[%s940_s5 + $0x60] sm:$0xff]  ;;  %635 = vmatmul.msk.f32.vlgmr.msra.gmra.mxu2 %vm298_vm1, %v290_v1  ;;  %v295_v6 = vld [vmem:[%s940_s5 + $0x68] sm:$0xff]  ;;  %v296_v10 = vld [vmem:[%s940_s5 + $0x70] sm:$0xff]  ;;  %s646_s21 = sshll.u32 %s495_s16, 3  ;;  %s498_s28 = sshll.u32 %s990_s14, 4  ;;  %s499_s28 = int_to_ptr.vmem [resolvable:$true] %s498_s28 }
  0x20   : > { %v282_v3 = vld [vmem:[%s940_s5] sm:$0xff]  ;;  %639 = vmatmul.msk.f32.vlgmr.msra.gmra.mxu3 %vm298_vm1, %v294_v2  ;;  %v283_v7 = vld [vmem:[%s940_s5 + $0x8] sm:$0xff]  ;;  %v284_v11 = vld [vmem:[%s940_s5 + $0x10] sm:$0xff]  ;;  %s497_s25 = scalar_lea.hbm %s1102_s4, %s646_s21  ;;  %s745_s13 = scalar_lea.hbm %s1102_s4, 512 }
  0x21   : > { %v286_v4 = vld [vmem:[%s940_s5 + $0x20] sm:$0xff]  ;;  %627 = vmatmul.msk.f32.vlgmr.msra.gmra.mxu0 %vm298_vm1, %v282_v3  ;;  %v287_v8 = vld [vmem:[%s940_s5 + $0x28] sm:$0xff]  ;;  %v288_v12 = vld [vmem:[%s940_s5 + $0x30] sm:$0xff]  ;;  %s500_s20 = sshll.u32 %s497_s25, 4  ;;  %s501_s20 = int_to_ptr.hbm [resolvable:$true] %s500_s20 }
  0x22   : > { %631 = vmatmul.msk.f32.vlgmr.msra.gmra.mxu1 %vm298_vm1, %v286_v4  ;;  %v293_v13 = vld [vmem:[%s940_s5 + $0x58] sm:$0xff]  ;;  %v434_v19 = vld [vmem:[%s980_s12] sm:$0xff]  ;;  %v435_v35 = vld [vmem:[%s980_s12 + $0x8] sm:$0xff]  ;;  %s739_s6 = sshra.s32 %s501_s20, 4  ;;  %s740_s6 = int_to_ptr.hbm [resolvable:$true] %s739_s6 }
  0x23   : > { %v297_v14 = vld [vmem:[%s940_s5 + $0x78] sm:$0xff]  ;;  %v438_v21 = vld [vmem:[%s980_s12 + $0x20] sm:$0xff]  ;;  %v439_v37 = vld [vmem:[%s980_s12 + $0x28] sm:$0xff]  ;;  %s741_s10 = scalar_lea.hbm %s740_s6, 128  ;;  %p746_p4 = scmp.lt.s32.totalorder %s740_s6, %s1102_s4 }
  0x24   : > { %v285_v15 = vld [vmem:[%s940_s5 + $0x18] sm:$0xff]  ;;  %v442_v27 = vld [vmem:[%s980_s12 + $0x40] sm:$0xff]  ;;  %v443_v43 = vld [vmem:[%s980_s12 + $0x48] sm:$0xff]  ;;  %p742_p0 = scmp.ne.s32.totalorder %s740_s6, %s741_s10  ;;  %p747_p5 = scmp.lt.s32.totalorder %s745_s13, %s741_s10 }
  0x25   : > { %v289_v16 = vld [vmem:[%s940_s5 + $0x38] sm:$0xff]  ;;  %v446_v29 = vld [vmem:[%s980_s12 + $0x60] sm:$0xff]  ;;  %v447_v45 = vld [vmem:[%s980_s12 + $0x68] sm:$0xff]  ;;  %s484_s5 = scalar_lea.sflag [#allocation4], %s253_s7 }
  0x26   : > { %v436_v51 = vld [vmem:[%s980_s12 + $0x10] sm:$0xff]  ;;  %v437_v3 = vld [vmem:[%s980_s12 + $0x18] sm:$0xff]  ;;  %p743_p1 = pnand %p742_p0, %p902_p3  ;;  %p748_p6 = por %p747_p5, %p746_p4 }
  0x27   : > { %636 = vmatmul.msk.f32.gmra.mxu2 %vm298_vm1, %v291_v5  ;;  %v440_v53 = vld [vmem:[%s980_s12 + $0x30] sm:$0xff]  ;;  %v441_v5 = vld [vmem:[%s980_s12 + $0x38] sm:$0xff] }
  0x28   : > { %640 = vmatmul.msk.f32.gmra.mxu3 %vm298_vm1, %v295_v6  ;;  %v444_v59 = vld [vmem:[%s980_s12 + $0x50] sm:$0xff]  ;;  %p744_p2 = pneg %p743_p1 }
  0x29   : > { %628 = vmatmul.msk.f32.gmra.mxu0 %vm298_vm1, %v283_v7  ;;  %v448_v61 = vld [vmem:[%s980_s12 + $0x70] sm:$0xff] }
  0x2a   : > { %632 = vmatmul.msk.f32.gmra.mxu1 %vm298_vm1, %v287_v8  ;;  %p749_p7 = pnand %p748_p6, %p744_p2 }
  0x2f   : > { %637 = vmatmul.msk.f32.gmra.mxu2 %vm298_vm1, %v292_v9 }
  0x30   : > { %641 = vmatmul.msk.f32.gmra.mxu3 %vm298_vm1, %v296_v10 }
  0x31   : > { %629 = vmatmul.msk.f32.gmra.mxu0 %vm298_vm1, %v284_v11  ;;  %v445_v11 = vld [vmem:[%s980_s12 + $0x58] sm:$0xff] }
  0x32   : > { %633 = vmatmul.msk.f32.gmra.mxu1 %vm298_vm1, %v288_v12 }
  0x37   : > { %638 = vmatmul.msk.f32.gmra.mxu2 %vm298_vm1, %v293_v13  ;;  %v449_v13 = vld [vmem:[%s980_s12 + $0x78] sm:$0xff] }
  0x38   : > { %642 = vmatmul.msk.f32.gmra.mxu3 %vm298_vm1, %v297_v14 }
  0x39   : > { %630 = vmatmul.msk.f32.gmra.mxu0 %vm298_vm1, %v285_v15 }
  0x3a   : > { %634 = vmatmul.msk.f32.gmra.mxu1 %vm298_vm1, %v289_v16 }
  0x9e   : > { %v368_v18 = vpop.f32.mrf.mxu0 }
  0x9f   : > { %v380_v20 = vpop.f32.mrf.mxu1  ;;  %v418_v22 = vmul.f32 %v982_v17, %v368_v18 }
  0xa0   : > { %v422_v23 = vmul.f32 %v982_v17, %v380_v20 }
  0xa1   : > { %v450_v24 = vadd.f32 %v434_v19, %v418_v22 }
  0xa2   : > { %v454_v25 = vadd.f32 %v438_v21, %v422_v23  ;;  %v392_v26 = vpop.f32.mrf.mxu2 }
  0xa3   : > { %467 = vst.msk [vmem:[%s990_s14] sm:$0xff] %vm466_vm2, %v450_v24  ;;  %v404_v28 = vpop.f32.mrf.mxu3  ;;  %v426_v30 = vmul.f32 %v982_v17, %v392_v26 }
  0xa4   : > { %471 = vst.msk [vmem:[%s990_s14 + $0x20] sm:$0xff] %vm466_vm2, %v454_v25  ;;  %v430_v31 = vmul.f32 %v982_v17, %v404_v28 }
  0xa5   : > { %v458_v32 = vadd.f32 %v442_v27, %v426_v30 }
  0xa6   : > { %v462_v33 = vadd.f32 %v446_v29, %v430_v31  ;;  %v371_v34 = vpop.f32.mrf.mxu0 }
  0xa7   : > { %v383_v36 = vpop.f32.mrf.mxu1  ;;  %v419_v38 = vmul.f32 %v982_v17, %v371_v34  ;;  %475 = vst.msk [vmem:[%s990_s14 + $0x40] sm:$0xff] %vm466_vm2, %v458_v32 }
  0xa8   : > { %v423_v39 = vmul.f32 %v982_v17, %v383_v36  ;;  %479 = vst.msk [vmem:[%s990_s14 + $0x60] sm:$0xff] %vm466_vm2, %v462_v33 }
  0xa9   : > { %v451_v40 = vadd.f32 %v435_v35, %v419_v38 }
  0xaa   : > { %v455_v41 = vadd.f32 %v439_v37, %v423_v39  ;;  %v395_v42 = vpop.f32.mrf.mxu2 }
  0xab   : > { %468 = vst.msk [vmem:[%s990_s14 + $0x8] sm:$0xff] %vm466_vm2, %v451_v40  ;;  %v407_v44 = vpop.f32.mrf.mxu3  ;;  %v427_v46 = vmul.f32 %v982_v17, %v395_v42 }
  0xac   : > { %472 = vst.msk [vmem:[%s990_s14 + $0x28] sm:$0xff] %vm466_vm2, %v455_v41  ;;  %v431_v47 = vmul.f32 %v982_v17, %v407_v44 }
  0xad   : > { %v459_v48 = vadd.f32 %v443_v43, %v427_v46 }
  0xae   : > { %v463_v49 = vadd.f32 %v447_v45, %v431_v47  ;;  %v374_v50 = vpop.f32.mrf.mxu0 }
  0xaf   : > { %v386_v52 = vpop.f32.mrf.mxu1  ;;  %v420_v54 = vmul.f32 %v982_v17, %v374_v50  ;;  %476 = vst.msk [vmem:[%s990_s14 + $0x48] sm:$0xff] %vm466_vm2, %v459_v48 }
  0xb0   : > { %v424_v55 = vmul.f32 %v982_v17, %v386_v52  ;;  %480 = vst.msk [vmem:[%s990_s14 + $0x68] sm:$0xff] %vm466_vm2, %v463_v49 }
  0xb1   : > { %v452_v56 = vadd.f32 %v436_v51, %v420_v54 }
  0xb2   : > { %v456_v57 = vadd.f32 %v440_v53, %v424_v55  ;;  %v398_v58 = vpop.f32.mrf.mxu2 }
  0xb3   : > { %469 = vst.msk [vmem:[%s990_s14 + $0x10] sm:$0xff] %vm466_vm2, %v452_v56  ;;  %v410_v60 = vpop.f32.mrf.mxu3  ;;  %v428_v62 = vmul.f32 %v982_v17, %v398_v58 }
  0xb4   : > { %473 = vst.msk [vmem:[%s990_s14 + $0x30] sm:$0xff] %vm466_vm2, %v456_v57  ;;  %v432_v63 = vmul.f32 %v982_v17, %v410_v60 }
  0xb5   : > { %v460_v0 = vadd.f32 %v444_v59, %v428_v62 }
  0xb6   : > { %v464_v1 = vadd.f32 %v448_v61, %v432_v63  ;;  %v377_v2 = vpop.f32.mrf.mxu0 }
  0xb7   : > { %v389_v4 = vpop.f32.mrf.mxu1  ;;  %v421_v6 = vmul.f32 %v982_v17, %v377_v2  ;;  %477 = vst.msk [vmem:[%s990_s14 + $0x50] sm:$0xff] %vm466_vm2, %v460_v0 }
  0xb8   : > { %v425_v7 = vmul.f32 %v982_v17, %v389_v4  ;;  %481 = vst.msk [vmem:[%s990_s14 + $0x70] sm:$0xff] %vm466_vm2, %v464_v1 }
  0xb9   : > { %v453_v8 = vadd.f32 %v437_v3, %v421_v6 }
  0xba   : > { %v457_v9 = vadd.f32 %v441_v5, %v425_v7  ;;  %v401_v10 = vpop.f32.mrf.mxu2 }
  0xbb   : > { %470 = vst.msk [vmem:[%s990_s14 + $0x18] sm:$0xff] %vm466_vm2, %v453_v8  ;;  %v413_v12 = vpop.f32.mrf.mxu3  ;;  %v429_v14 = vmul.f32 %v982_v17, %v401_v10 }
  0xbc   : > { %474 = vst.msk [vmem:[%s990_s14 + $0x38] sm:$0xff] %vm466_vm2, %v457_v9  ;;  %v433_v15 = vmul.f32 %v982_v17, %v413_v12 }
  0xbd   : > { %v461_v16 = vadd.f32 %v445_v11, %v429_v14 }
  0xbe   : > { %v465_v18 = vadd.f32 %v449_v13, %v433_v15 }
  0xbf   : > { %478 = vst.msk [vmem:[%s990_s14 + $0x58] sm:$0xff] %vm466_vm2, %v461_v16 }
  0xc0   : > { %482 = vst.msk [vmem:[%s990_s14 + $0x78] sm:$0xff] %vm466_vm2, %v465_v18 }
  0xc1   : > { %752 = shalt.err (!%p749_p7)
}
  0xc2   : > { %s821_s7 = smov 128   ;;  %s822_s14 = smov 8  }
  0xc3   : > { %652 = dma.vmem_to_hbm [thread:$0]  (%p902_p3), %s499_s28, 2048, %s501_s20, %s484_s5, %s821_s7, %s821_s7, %s822_s14  }
  0xc4 PF: > { %p658_p9 = scmp.ge.s32.totalorder %s819_s24, 2  ;;  %s515_s21 = sand.u32 1, %s791_s17  }
  0xc5   : > { %s516_s9 = scalar_lea.sflag [#allocation4], %s515_s21 }
  0xc6   : > { %p655_p10 = pnand %p658_p9, %p911_p8 }
  0xc8   : > { %p656_p11 = pneg %p655_p10 }
  0xca   : > { %786 = dma.done.wait (%p656_p11), %s516_s9, 2048  }
  0xcb   : > { %788 = vsyncadd (%p656_p11), %s516_s9, 4294965248  ;;  %s18_s24 = sadd.s32 1, %s819_s24   ;;  %s1105_s17 = smov %s795_s18 }
  0xcc   : > { %p15_p12 = scmp.ge.s32.totalorder %s18_s24, 6   ;;  %s1106_s18 = smov %s799_s19 }
  0xcd   : > { %s1107_s19 = smov %s920_s8  ;;  %s1108_s20 = smov %s811_s22 }
  0xce   : > { %s1109_s21 = smov %s815_s23  ;;  %s1110_s22 = smov %s1113_s26 }
  0xcf   : > { %s1111_s23 = smov %s1117_s27  ;;  %17 = sbr.rel (!%p15_p12) target bundleno = 7 (0x7), region = 77 }
  0xd4   :  { %522 = vsyncpa [#allocation4], 1 }
  0xd5   :  { %524 = vsyncpa [#allocation4 + $0x1], 1 }

</bundles_post_ra>
